<compile_context>
chip_gen: v7x
topology: tpu7x:2x2x1
jax: 0.10.0
libtpu: 0.0.40
codegen_flags: <defaults>
</compile_context>

<pallas_src>
import jax
import jax.numpy as jnp
from jax.experimental import pallas as pl
from jax.experimental.pallas import tpu as pltpu


# ---------------------------------------------------------------------------
# Kernels
# ---------------------------------------------------------------------------
def _l2_mean_partials_kernel(mu_ref, x_ref, partial_ref):
    """Per row-tile, lane-dense partial sum of squared differences.

    Grid: (row tiles [parallel], feature tiles [arbitrary]).
    partial_ref block is (1, tile_d) and is resident across the feature axis,
    so it doubles as the accumulator (zeroed on the first feature step).
    Only a sublane (axis=0) reduce happens in the hot loop; the cross-lane
    reduce + mean are done outside the kernel on a tiny array.
    """
    @pl.when(pl.program_id(1) == 0)
    def _():
        partial_ref[...] = jnp.zeros_like(partial_ref)

    diff = x_ref[...] - mu_ref[...]
    partial_ref[...] += jnp.sum(diff * diff, axis=0, keepdims=True)


def _l2_rowwise_kernel(mu_ref, x_ref, out_ref):
    """Per-row squared L2 distance, accumulated over feature tiles."""
    @pl.when(pl.program_id(1) == 0)
    def _():
        out_ref[...] = jnp.zeros_like(out_ref)

    diff = x_ref[...] - mu_ref[...]
    out_ref[...] += jnp.sum(diff * diff, axis=1, keepdims=True)


# ---------------------------------------------------------------------------
# Tile selection + wrapper
# ---------------------------------------------------------------------------
_MAX_TILE_D = 512           # lane-axis block (multiple of 128)
_MAX_TILE_ROWS = 1024       # sublane-axis block (multiple of 8)
# Per-input-block byte budget: 2 inputs x 2 pipeline buffers x this stays well
# under the 32 MiB default scoped-VMEM limit on all generations (incl. v7x).
_BLOCK_BYTES_BUDGET = 4 * 1024 * 1024


def _round_up(v, m):
    return (v + m - 1) // m * m


def _choose_tiles(n, d):
    tile_d = d if d <= _MAX_TILE_D else _MAX_TILE_D
    rows = _BLOCK_BYTES_BUDGET // (tile_d * 4)
    rows = max(8, min(rows, _MAX_TILE_ROWS))
    rows = (rows // 8) * 8
    rows = min(rows, _round_up(n, 8))      # never bigger than the padded batch
    return rows, tile_d


def l2_norm_loss(mu, x, *, reduce=True, tile_rows=None, tile_d=None):
    """Pallas implementation of L2NormLoss.forward(mu, x) for 2-D inputs."""
    assert mu.shape == x.shape and mu.ndim == 2
    n, d = x.shape

    auto_rows, auto_d = _choose_tiles(n, d)
    tile_rows = auto_rows if tile_rows is None else tile_rows
    tile_d = auto_d if tile_d is None else tile_d
    assert tile_rows % 8 == 0, "row tile must be sublane-aligned (multiple of 8)"
    assert tile_d == d or tile_d % 128 == 0, "feature tile must be 128-aligned or full D"

    # Pad to the tile grid; zero rows/cols contribute nothing to the sums.
    n_pad = _round_up(n, tile_rows)
    d_pad = _round_up(d, tile_d)
    mu = mu.astype(jnp.float32)
    x = x.astype(jnp.float32)
    if (n_pad, d_pad) != (n, d):
        pad = ((0, n_pad - n), (0, d_pad - d))
        mu = jnp.pad(mu, pad)
        x = jnp.pad(x, pad)

    grid_rows = n_pad // tile_rows
    grid_d = d_pad // tile_d
    in_specs = [
        pl.BlockSpec((tile_rows, tile_d), lambda i, j: (i, j)),
        pl.BlockSpec((tile_rows, tile_d), lambda i, j: (i, j)),
    ]
    cparams = pltpu.CompilerParams(
        dimension_semantics=("parallel", "arbitrary"),
    )

    if reduce:
        partials = pl.pallas_call(
            _l2_mean_partials_kernel,
            out_shape=jax.ShapeDtypeStruct((grid_rows, tile_d), jnp.float32),
            grid=(grid_rows, grid_d),
            in_specs=in_specs,
            out_specs=pl.BlockSpec((1, tile_d), lambda i, j: (i, 0)),
            compiler_params=cparams,
        )(mu, x)
        # Tiny epilogue: single cross-lane reduce over (grid_rows, tile_d).
        return jnp.sum(partials) / jnp.float32(n)
    else:
        out = pl.pallas_call(
            _l2_rowwise_kernel,
            out_shape=jax.ShapeDtypeStruct((n_pad, 1), jnp.float32),
            grid=(grid_rows, grid_d),
            in_specs=in_specs,
            out_specs=pl.BlockSpec((tile_rows, 1), lambda i, j: (i, 0)),
            compiler_params=cparams,
        )(mu, x)
        return out[:n, 0]


if __name__ == "__main__":
    # L2NormLoss has no learnable parameters; only two inputs (mu, x).
    key = jax.random.PRNGKey(0)
    k_mu, k_x = jax.random.split(key)

    # Small shapes consistent with the module: (batch rows, feature dim).
    # N is deliberately not a multiple of 8 to exercise the tail-padding path.
    N, D = 300, 32
    mu = jax.random.normal(k_mu, (N, D), dtype=jnp.float32)
    x = jax.random.normal(k_x, (N, D), dtype=jnp.float32)

    loss = jax.block_until_ready(l2_norm_loss(mu, x, reduce=True))
    rows = jax.block_until_ready(l2_norm_loss(mu, x, reduce=False))

    diff = x - mu
    ref_rows = jnp.sum(diff * diff, axis=1)
    ref_loss = jnp.mean(ref_rows)
    assert jnp.allclose(loss, ref_loss, rtol=1e-5, atol=1e-5)
    assert jnp.allclose(rows, ref_rows, rtol=1e-5, atol=1e-5)

    # Exercise the multi-tile accumulation paths (several row tiles AND several
    # feature tiles, plus row padding) with forced small tiles at tiny shapes.
    N2, D2 = 40, 256
    k_mu2, k_x2 = jax.random.split(jax.random.PRNGKey(1))
    mu2 = jax.random.normal(k_mu2, (N2, D2), dtype=jnp.float32)
    x2 = jax.random.normal(k_x2, (N2, D2), dtype=jnp.float32)
    loss2 = jax.block_until_ready(
        l2_norm_loss(mu2, x2, reduce=True, tile_rows=16, tile_d=128))
    rows2 = jax.block_until_ready(
        l2_norm_loss(mu2, x2, reduce=False, tile_rows=16, tile_d=128))
    d2 = x2 - mu2
    ref_rows2 = jnp.sum(d2 * d2, axis=1)
    assert jnp.allclose(loss2, jnp.mean(ref_rows2), rtol=1e-5, atol=1e-5)
    assert jnp.allclose(rows2, ref_rows2, rtol=1e-5, atol=1e-5)

    print("KERNEL_OK")
</pallas_src>

<mosaic_0001>
module attributes {stable_mosaic.version = 11 : i64} {
  func.func @_l2_mean_partials_kernel(%arg0: i32, %arg1: i32, %arg2: memref<304x32xf32, #tpu.memory_space<vmem>>, %arg3: memref<304x32xf32, #tpu.memory_space<vmem>>, %arg4: memref<1x32xf32, #tpu.memory_space<vmem>>) attributes {dimension_semantics = [#tpu.dimension_semantics<parallel>, #tpu.dimension_semantics<arbitrary>], iteration_bounds = array<i64: 1, 1>, scalar_prefetch = 0 : i64, scratch_operands = 0 : i64, tpu.core_type = #tpu.core_type<tc>, window_params = [{transform_indices = @transform_0, window_bounds = array<i64: 304, 32>}, {transform_indices = @transform_1, window_bounds = array<i64: 304, 32>}, {transform_indices = @transform_2, window_bounds = array<i64: 1, 32>}]} {
    %c0_i32 = arith.constant 0 : i32
    %0 = arith.cmpi eq, %arg1, %c0_i32 : i32
    %1 = arith.extui %0 : i1 to i32
    %c0_i32_0 = arith.constant 0 : i32
    %2 = arith.cmpi ne, %1, %c0_i32_0 : i32
    scf.if %2 {
      %cst_8 = arith.constant 0.000000e+00 : f32
      %12 = vector.broadcast %cst_8 : f32 to vector<1x32xf32>
      %c0_9 = arith.constant 0 : index
      %c0_10 = arith.constant 0 : index
      %13 = vector.load %arg4[%c0_9, %c0_10] : memref<1x32xf32, #tpu.memory_space<vmem>>, vector<1x32xf32>
      tpu.vector_store %arg4[%c0_9, %c0_10], %12 {strides = array<i32>} : memref<1x32xf32, #tpu.memory_space<vmem>>, vector<1x32xf32>,
    } else {
    }
    %c0 = arith.constant 0 : index
    %c0_1 = arith.constant 0 : index
    %3 = vector.load %arg3[%c0, %c0_1] : memref<304x32xf32, #tpu.memory_space<vmem>>, vector<304x32xf32>
    %c0_2 = arith.constant 0 : index
    %c0_3 = arith.constant 0 : index
    %4 = vector.load %arg2[%c0_2, %c0_3] : memref<304x32xf32, #tpu.memory_space<vmem>>, vector<304x32xf32>
    %5 = arith.subf %3, %4 : vector<304x32xf32>
    %c0_4 = arith.constant 0 : index
    %c0_5 = arith.constant 0 : index
    %6 = vector.load %arg4[%c0_4, %c0_5] : memref<1x32xf32, #tpu.memory_space<vmem>>, vector<1x32xf32>
    %7 = arith.mulf %5, %5 : vector<304x32xf32>
    %cst = arith.constant dense<0.000000e+00> : vector<32xf32>
    %8 = vector.multi_reduction <add>, %7, %cst [0] : vector<304x32xf32> to vector<32xf32>
    %9 = vector.shape_cast %8 : vector<32xf32> to vector<1x32xf32>
    %10 = arith.addf %6, %9 : vector<1x32xf32>
    %c0_6 = arith.constant 0 : index
    %c0_7 = arith.constant 0 : index
    %11 = vector.load %arg4[%c0_6, %c0_7] : memref<1x32xf32, #tpu.memory_space<vmem>>, vector<1x32xf32>
    tpu.vector_store %arg4[%c0_6, %c0_7], %10 {strides = array<i32>} : memref<1x32xf32, #tpu.memory_space<vmem>>, vector<1x32xf32>,
    return
  }
  func.func @transform_0(%arg0: i32, %arg1: i32) -> (i32, i32) {
    %c0_i32 = arith.constant 0 : i32
    return %arg0, %arg1 : i32, i32
  }
  func.func @transform_1(%arg0: i32, %arg1: i32) -> (i32, i32) {
    %c0_i32 = arith.constant 0 : i32
    return %arg0, %arg1 : i32, i32
  }
  func.func @transform_2(%arg0: i32, %arg1: i32) -> (i32, i32) {
    %c0_i32 = arith.constant 0 : i32
    %c0_i32_0 = arith.constant 0 : i32
    return %arg0, %c0_i32 : i32, i32
  }
}

</mosaic_0001>

<bundles_post_ra>
// kernel: tpu_custom_call.1
= control target key start
LH: loop header
LB: loop body
LE: loop exit
PB: predicated region body
PF: predicated region fallthrough
CT: control target
= control target key end

     0   :  { %7 = vsyncpa [#allocation3], 0  ;;  %vm16_vm0 = vcmask 253952   ;;  %v296_v0 = vmov 0.0   ;;  %vm171_vm1 = vcmask 261120   ;;  %s593_s0 = inlined_call_operand.vmem [shape: f32[304,32], index: 0, kind: input, shape index: {}]   ;;  %s594_s1 = inlined_call_operand.vmem [shape: f32[304,32], index: 1, kind: input, shape index: {}]   ;;  %s595_s2 = inlined_call_operand.hbm [shape: f32[1,32], index: 2, kind: output, shape index: {}]  }
   0x1   :  { %17 = vst.msk [vmem:[#allocation2] sm:$0x1] %vm16_vm0, %v296_v0  ;;  %v18_v1 = vld [vmem:[%s594_s1] sm:$0xff]  ;;  %v19_v2 = vld [vmem:[%s594_s1 + $0x8] sm:$0xff]  ;;  %v20_v5 = vld [vmem:[%s594_s1 + $0x10] sm:$0xff] }
   0x2   :  { %v56_v3 = vld [vmem:[%s593_s0] sm:$0xff]  ;;  %v57_v4 = vld [vmem:[%s593_s0 + $0x8] sm:$0xff]  ;;  %v58_v6 = vld [vmem:[%s593_s0 + $0x10] sm:$0xff] }
   0x3   :  { %v21_v7 = vld [vmem:[%s594_s1 + $0x18] sm:$0xff]  ;;  %v94_v9 = vsub.f32 %v18_v1, %v56_v3  ;;  %v95_v10 = vsub.f32 %v19_v2, %v57_v4  ;;  %v22_v11 = vld [vmem:[%s594_s1 + $0x20] sm:$0xff]  ;;  %v96_v13 = vsub.f32 %v20_v5, %v58_v6  ;;  %v23_v15 = vld [vmem:[%s594_s1 + $0x28] sm:$0xff] }
   0x4   :  { %v59_v8 = vld [vmem:[%s593_s0 + $0x18] sm:$0xff]  ;;  %v60_v12 = vld [vmem:[%s593_s0 + $0x20] sm:$0xff]  ;;  %v61_v16 = vld [vmem:[%s593_s0 + $0x28] sm:$0xff] }
   0x5   :  { %v97_v14 = vsub.f32 %v21_v7, %v59_v8  ;;  %v98_v17 = vsub.f32 %v22_v11, %v60_v12  ;;  %v133_v18 = vmul.f32 %v94_v9, %v94_v9  ;;  %v134_v19 = vmul.f32 %v95_v10, %v95_v10  ;;  %v24_v20 = vld [vmem:[%s594_s1 + $0x30] sm:$0xff]  ;;  %v25_v25 = vld [vmem:[%s594_s1 + $0x38] sm:$0xff]  ;;  %v26_v31 = vld [vmem:[%s594_s1 + $0x40] sm:$0xff] }
   0x6   :  { %v62_v21 = vld [vmem:[%s593_s0 + $0x30] sm:$0xff]  ;;  %v135_v22 = vmul.f32 %v96_v13, %v96_v13  ;;  %v99_v23 = vsub.f32 %v23_v15, %v61_v16  ;;  %v63_v26 = vld [vmem:[%s593_s0 + $0x38] sm:$0xff]  ;;  %v64_v32 = vld [vmem:[%s593_s0 + $0x40] sm:$0xff] }
   0x7   :  { %v136_v24 = vmul.f32 %v97_v14, %v97_v14  ;;  %v100_v27 = vsub.f32 %v24_v20, %v62_v21  ;;  %v137_v28 = vmul.f32 %v98_v17, %v98_v17  ;;  %v172_v29 = vsel %vm171_vm1, %v133_v18, 0.0  ;;  %v27_v38 = vld [vmem:[%s594_s1 + $0x48] sm:$0xff]  ;;  %v28_v44 = vld [vmem:[%s594_s1 + $0x50] sm:$0xff]  ;;  %v29_v50 = vld [vmem:[%s594_s1 + $0x58] sm:$0xff] }
   0x8   :  { %v173_v30 = vsel %vm171_vm1, %v134_v19, 0.0  ;;  %v175_v34 = vsel %vm171_vm1, %v135_v22, 0.0  ;;  %v101_v35 = vsub.f32 %v25_v25, %v63_v26  ;;  %v138_v36 = vmul.f32 %v99_v23, %v99_v23  ;;  %v65_v39 = vld [vmem:[%s593_s0 + $0x48] sm:$0xff]  ;;  %v66_v45 = vld [vmem:[%s593_s0 + $0x50] sm:$0xff]  ;;  %v67_v51 = vld [vmem:[%s593_s0 + $0x58] sm:$0xff] }
   0x9   :  { %v174_v33 = vadd.f32 %v173_v30, %v172_v29  ;;  %v177_v37 = vsel %vm171_vm1, %v136_v24, 0.0  ;;  %v102_v41 = vsub.f32 %v26_v31, %v64_v32  ;;  %v139_v42 = vmul.f32 %v100_v27, %v100_v27  ;;  %v30_v56 = vld [vmem:[%s594_s1 + $0x60] sm:$0xff]  ;;  %v31_v62 = vld [vmem:[%s594_s1 + $0x68] sm:$0xff]  ;;  %v32_v4 = vld [vmem:[%s594_s1 + $0x70] sm:$0xff] }
   0xa   :  { %v179_v43 = vsel %vm171_vm1, %v137_v28, 0.0  ;;  %v103_v47 = vsub.f32 %v27_v38, %v65_v39  ;;  %v140_v48 = vmul.f32 %v101_v35, %v101_v35  ;;  %v181_v49 = vsel %vm171_vm1, %v138_v36, 0.0  ;;  %v68_v57 = vld [vmem:[%s593_s0 + $0x60] sm:$0xff]  ;;  %v69_v63 = vld [vmem:[%s593_s0 + $0x68] sm:$0xff]  ;;  %v70_v5 = vld [vmem:[%s593_s0 + $0x70] sm:$0xff] }
   0xb   :  { %v176_v40 = vadd.f32 %v175_v34, %v174_v33  ;;  %v104_v53 = vsub.f32 %v28_v44, %v66_v45  ;;  %v141_v54 = vmul.f32 %v102_v41, %v102_v41  ;;  %v183_v55 = vsel %vm171_vm1, %v139_v42, 0.0  ;;  %v33_v10 = vld [vmem:[%s594_s1 + $0x78] sm:$0xff]  ;;  %v34_v16 = vld [vmem:[%s594_s1 + $0x80] sm:$0xff]  ;;  %v35_v22 = vld [vmem:[%s594_s1 + $0x88] sm:$0xff] }
   0xc   :  { %v105_v59 = vsub.f32 %v29_v50, %v67_v51  ;;  %v142_v60 = vmul.f32 %v103_v47, %v103_v47  ;;  %v185_v61 = vsel %vm171_vm1, %v140_v48, 0.0  ;;  %v106_v1 = vsub.f32 %v30_v56, %v68_v57  ;;  %v71_v11 = vld [vmem:[%s593_s0 + $0x78] sm:$0xff]  ;;  %v72_v17 = vld [vmem:[%s593_s0 + $0x80] sm:$0xff]  ;;  %v73_v23 = vld [vmem:[%s593_s0 + $0x88] sm:$0xff] }
   0xd   :  { %v178_v46 = vadd.f32 %v177_v37, %v176_v40  ;;  %v143_v2 = vmul.f32 %v104_v53, %v104_v53  ;;  %v187_v3 = vsel %vm171_vm1, %v141_v54, 0.0  ;;  %v107_v7 = vsub.f32 %v31_v62, %v69_v63  ;;  %v36_v28 = vld [vmem:[%s594_s1 + $0x90] sm:$0xff]  ;;  %v37_v34 = vld [vmem:[%s594_s1 + $0x98] sm:$0xff]  ;;  %v38_v40 = vld [vmem:[%s594_s1 + $0xa0] sm:$0xff] }
   0xe   :  { %v144_v8 = vmul.f32 %v105_v59, %v105_v59  ;;  %v189_v9 = vsel %vm171_vm1, %v142_v60, 0.0  ;;  %v108_v13 = vsub.f32 %v32_v4, %v70_v5  ;;  %v145_v14 = vmul.f32 %v106_v1, %v106_v1  ;;  %v74_v29 = vld [vmem:[%s593_s0 + $0x90] sm:$0xff]  ;;  %v75_v35 = vld [vmem:[%s593_s0 + $0x98] sm:$0xff]  ;;  %v76_v41 = vld [vmem:[%s593_s0 + $0xa0] sm:$0xff] }
   0xf   :  { %v180_v52 = vadd.f32 %v179_v43, %v178_v46  ;;  %v191_v15 = vsel %vm171_vm1, %v143_v2, 0.0  ;;  %v109_v19 = vsub.f32 %v33_v10, %v71_v11  ;;  %v146_v20 = vmul.f32 %v107_v7, %v107_v7  ;;  %v39_v46 = vld [vmem:[%s594_s1 + $0xa8] sm:$0xff]  ;;  %v78_v53 = vld [vmem:[%s593_s0 + $0xb0] sm:$0xff]  ;;  %v79_v59 = vld [vmem:[%s593_s0 + $0xb8] sm:$0xff] }
  0x10   :  { %v193_v21 = vsel %vm171_vm1, %v144_v8, 0.0  ;;  %v110_v25 = vsub.f32 %v34_v16, %v72_v17  ;;  %v147_v26 = vmul.f32 %v108_v13, %v108_v13  ;;  %v195_v27 = vsel %vm171_vm1, %v145_v14, 0.0  ;;  %v77_v47 = vld [vmem:[%s593_s0 + $0xa8] sm:$0xff]  ;;  %v80_v1 = vld [vmem:[%s593_s0 + $0xc0] sm:$0xff]  ;;  %v82_v13 = vld [vmem:[%s593_s0 + $0xd0] sm:$0xff] }
  0x11   :  { %v182_v58 = vadd.f32 %v181_v49, %v180_v52  ;;  %v111_v31 = vsub.f32 %v35_v22, %v73_v23  ;;  %v148_v32 = vmul.f32 %v109_v19, %v109_v19  ;;  %v197_v33 = vsel %vm171_vm1, %v146_v20, 0.0  ;;  %v40_v52 = vld [vmem:[%s594_s1 + $0xb0] sm:$0xff]  ;;  %v81_v7 = vld [vmem:[%s593_s0 + $0xc8] sm:$0xff]  ;;  %v83_v19 = vld [vmem:[%s593_s0 + $0xd8] sm:$0xff] }
  0x12   :  { %v112_v37 = vsub.f32 %v36_v28, %v74_v29  ;;  %v149_v38 = vmul.f32 %v110_v25, %v110_v25  ;;  %v199_v39 = vsel %vm171_vm1, %v147_v26, 0.0  ;;  %v113_v43 = vsub.f32 %v37_v34, %v75_v35  ;;  %v84_v25 = vld [vmem:[%s593_s0 + $0xe0] sm:$0xff] }
  0x13   :  { %v184_v0 = vadd.f32 %v183_v55, %v182_v58  ;;  %v150_v44 = vmul.f32 %v111_v31, %v111_v31  ;;  %v201_v45 = vsel %vm171_vm1, %v148_v32, 0.0  ;;  %v114_v49 = vsub.f32 %v38_v40, %v76_v41  ;;  %v41_v58 = vld [vmem:[%s594_s1 + $0xb8] sm:$0xff]  ;;  %v85_v31 = vld [vmem:[%s593_s0 + $0xe8] sm:$0xff] }
  0x14   :  { %v151_v50 = vmul.f32 %v112_v37, %v112_v37  ;;  %v203_v51 = vsel %vm171_vm1, %v149_v38, 0.0  ;;  %v115_v55 = vsub.f32 %v39_v46, %v77_v47  ;;  %v152_v56 = vmul.f32 %v113_v43, %v113_v43  ;;  %v86_v37 = vld [vmem:[%s593_s0 + $0xf0] sm:$0xff]  ;;  %v87_v43 = vld [vmem:[%s593_s0 + $0xf8] sm:$0xff] }
  0x15   :  { %v186_v6 = vadd.f32 %v185_v61, %v184_v0  ;;  %v205_v57 = vsel %vm171_vm1, %v150_v44, 0.0  ;;  %v116_v61 = vsub.f32 %v40_v52, %v78_v53  ;;  %v153_v62 = vmul.f32 %v114_v49, %v114_v49  ;;  %v42_v0 = vld [vmem:[%s594_s1 + $0xc0] sm:$0xff] }
  0x16   :  { %v207_v63 = vsel %vm171_vm1, %v151_v50, 0.0  ;;  %v154_v4 = vmul.f32 %v115_v55, %v115_v55  ;;  %v209_v5 = vsel %vm171_vm1, %v152_v56, 0.0  ;;  %v88_v49 = vld [vmem:[%s593_s0 + $0x100] sm:$0xff]  ;;  %v89_v55 = vld [vmem:[%s593_s0 + $0x108] sm:$0xff] }
  0x17   :  { %v188_v12 = vadd.f32 %v187_v3, %v186_v6  ;;  %v117_v3 = vsub.f32 %v41_v58, %v79_v59  ;;  %v43_v6 = vld [vmem:[%s594_s1 + $0xc8] sm:$0xff]  ;;  %v155_v10 = vmul.f32 %v116_v61, %v116_v61  ;;  %v211_v11 = vsel %vm171_vm1, %v153_v62, 0.0  ;;  %v90_v61 = vld [vmem:[%s593_s0 + $0x110] sm:$0xff] }
  0x18   :  { %v213_v17 = vsel %vm171_vm1, %v154_v4, 0.0 }
  0x19   :  { %v190_v18 = vadd.f32 %v189_v9, %v188_v12  ;;  %v118_v9 = vsub.f32 %v42_v0, %v80_v1  ;;  %v44_v12 = vld [vmem:[%s594_s1 + $0xd0] sm:$0xff]  ;;  %v156_v16 = vmul.f32 %v117_v3, %v117_v3  ;;  %v215_v23 = vsel %vm171_vm1, %v155_v10, 0.0  ;;  %v91_v3 = vld [vmem:[%s593_s0 + $0x118] sm:$0xff] }
  0x1b   :  { %v192_v24 = vadd.f32 %v191_v15, %v190_v18  ;;  %v119_v15 = vsub.f32 %v43_v6, %v81_v7  ;;  %v45_v18 = vld [vmem:[%s594_s1 + $0xd8] sm:$0xff]  ;;  %v157_v22 = vmul.f32 %v118_v9, %v118_v9  ;;  %v217_v29 = vsel %vm171_vm1, %v156_v16, 0.0  ;;  %v92_v9 = vld [vmem:[%s593_s0 + $0x120] sm:$0xff] }
  0x1d   :  { %v194_v30 = vadd.f32 %v193_v21, %v192_v24  ;;  %v120_v21 = vsub.f32 %v44_v12, %v82_v13  ;;  %v46_v24 = vld [vmem:[%s594_s1 + $0xe0] sm:$0xff]  ;;  %v158_v28 = vmul.f32 %v119_v15, %v119_v15  ;;  %v219_v35 = vsel %vm171_vm1, %v157_v22, 0.0  ;;  %v93_v15 = vld [vmem:[%s593_s0 + $0x128] sm:$0xff]  ;;  %s297_s0 = smov [#allocation2]  }
  0x1f   :  { %v196_v36 = vadd.f32 %v195_v27, %v194_v30  ;;  %v121_v27 = vsub.f32 %v45_v18, %v83_v19  ;;  %v47_v30 = vld [vmem:[%s594_s1 + $0xe8] sm:$0xff]  ;;  %v159_v34 = vmul.f32 %v120_v21, %v120_v21  ;;  %v221_v41 = vsel %vm171_vm1, %v158_v28, 0.0 }
  0x21   :  { %v198_v42 = vadd.f32 %v197_v33, %v196_v36  ;;  %v122_v33 = vsub.f32 %v46_v24, %v84_v25  ;;  %v48_v36 = vld [vmem:[%s594_s1 + $0xf0] sm:$0xff]  ;;  %v160_v40 = vmul.f32 %v121_v27, %v121_v27  ;;  %v223_v47 = vsel %vm171_vm1, %v159_v34, 0.0 }
  0x23   :  { %v200_v48 = vadd.f32 %v199_v39, %v198_v42  ;;  %v123_v39 = vsub.f32 %v47_v30, %v85_v31  ;;  %v49_v42 = vld [vmem:[%s594_s1 + $0xf8] sm:$0xff]  ;;  %v161_v46 = vmul.f32 %v122_v33, %v122_v33  ;;  %v225_v53 = vsel %vm171_vm1, %v160_v40, 0.0 }
  0x25   :  { %v202_v54 = vadd.f32 %v201_v45, %v200_v48  ;;  %v124_v45 = vsub.f32 %v48_v36, %v86_v37  ;;  %v50_v48 = vld [vmem:[%s594_s1 + $0x100] sm:$0xff]  ;;  %v162_v52 = vmul.f32 %v123_v39, %v123_v39  ;;  %v227_v59 = vsel %vm171_vm1, %v161_v46, 0.0 }
  0x27   :  { %v204_v60 = vadd.f32 %v203_v51, %v202_v54  ;;  %v125_v51 = vsub.f32 %v49_v42, %v87_v43  ;;  %v51_v54 = vld [vmem:[%s594_s1 + $0x108] sm:$0xff]  ;;  %v163_v58 = vmul.f32 %v124_v45, %v124_v45  ;;  %v229_v1 = vsel %vm171_vm1, %v162_v52, 0.0 }
  0x29   :  { %v206_v2 = vadd.f32 %v205_v57, %v204_v60  ;;  %v126_v57 = vsub.f32 %v50_v48, %v88_v49  ;;  %v52_v60 = vld [vmem:[%s594_s1 + $0x110] sm:$0xff]  ;;  %v164_v0 = vmul.f32 %v125_v51, %v125_v51  ;;  %v231_v7 = vsel %vm171_vm1, %v163_v58, 0.0 }
  0x2b   :  { %v208_v8 = vadd.f32 %v207_v63, %v206_v2  ;;  %v127_v63 = vsub.f32 %v51_v54, %v89_v55  ;;  %v53_v2 = vld [vmem:[%s594_s1 + $0x118] sm:$0xff]  ;;  %v165_v6 = vmul.f32 %v126_v57, %v126_v57  ;;  %v233_v13 = vsel %vm171_vm1, %v164_v0, 0.0 }
  0x2d   :  { %v210_v14 = vadd.f32 %v209_v5, %v208_v8  ;;  %v128_v5 = vsub.f32 %v52_v60, %v90_v61  ;;  %v54_v8 = vld [vmem:[%s594_s1 + $0x120] sm:$0xff]  ;;  %v166_v12 = vmul.f32 %v127_v63, %v127_v63  ;;  %v235_v19 = vsel %vm171_vm1, %v165_v6, 0.0 }
  0x2f   :  { %v212_v20 = vadd.f32 %v211_v11, %v210_v14  ;;  %v129_v11 = vsub.f32 %v53_v2, %v91_v3  ;;  %v55_v14 = vld [vmem:[%s594_s1 + $0x128] sm:$0xff]  ;;  %v167_v18 = vmul.f32 %v128_v5, %v128_v5  ;;  %s262_s1 = sshll.u32 %s297_s0, 4  ;;  %s263_s1 = int_to_ptr.vmem [resolvable:$true] %s262_s1 }
  0x30   :  { %v131_v21 = vsub.f32 %v55_v14, %v93_v15  ;;  %s272_s21 = scalar_lea.vmem %s263_s1, 16  ;;  %s276_s22 = scalar_lea.vmem %s263_s1, 32 }
  0x31   :  { %v214_v26 = vadd.f32 %v213_v17, %v212_v20  ;;  %v130_v17 = vsub.f32 %v54_v8, %v92_v9  ;;  %v168_v22 = vmul.f32 %v129_v11, %v129_v11  ;;  %p273_p0 = scmp.ne.s32.totalorder %s263_s1, %s272_s21  ;;  %p277_p1 = scmp.lt.s32.totalorder %s263_s1, %s263_s1 }
  0x32   :  { %v170_v28 = vmul.f32 %v131_v21, %v131_v21  ;;  %p278_p2 = scmp.lt.s32.totalorder %s276_s22, %s272_s21 }
  0x33   :  { %v216_v32 = vadd.f32 %v215_v23, %v214_v26  ;;  %v237_v23 = vsel %vm171_vm1, %v166_v12, 0.0  ;;  %v169_v25 = vmul.f32 %v130_v17, %v130_v17  ;;  %v239_v26 = vsel %vm171_vm1, %v167_v18, 0.0 }
  0x34   :  { %v245_v33 = vsel %vm171_vm1, %v170_v28, 0.0  ;;  %p279_p3 = por %p278_p2, %p277_p1 }
  0x35   :  { %v218_v38 = vadd.f32 %v217_v29, %v216_v32  ;;  %v241_v29 = vsel %vm171_vm1, %v168_v22, 0.0  ;;  %v243_v31 = vsel %vm171_vm1, %v169_v25, 0.0 }
  0x36   :  { %p280_p4 = pnand %p279_p3, %p273_p0 }
  0x37   :  { %v220_v44 = vadd.f32 %v219_v35, %v218_v38 }
  0x39   :  { %v222_v50 = vadd.f32 %v221_v41, %v220_v44  ;;  %v132_v41 = vld [vmem:[#allocation2] sm:$0x1] }
  0x3b   :  { %v224_v56 = vadd.f32 %v223_v47, %v222_v50 }
  0x3d   :  { %v226_v62 = vadd.f32 %v225_v53, %v224_v56 }
  0x3f   :  { %v228_v4 = vadd.f32 %v227_v59, %v226_v62 }
  0x41   :  { %v230_v10 = vadd.f32 %v229_v1, %v228_v4 }
  0x43   :  { %v232_v16 = vadd.f32 %v231_v7, %v230_v10 }
  0x45   :  { %v234_v20 = vadd.f32 %v233_v13, %v232_v16 }
  0x47   :  { %v236_v24 = vadd.f32 %v235_v19, %v234_v20 }
  0x49   :  { %v238_v27 = vadd.f32 %v237_v23, %v236_v24 }
  0x4b   :  { %v240_v30 = vadd.f32 %v239_v26, %v238_v27 }
  0x4d   :  { %v242_v32 = vadd.f32 %v241_v29, %v240_v30 }
  0x4f   :  { %v244_v34 = vadd.f32 %v243_v31, %v242_v32 }
  0x51   :  { %v246_v35 = vadd.f32 %v245_v33, %v244_v34 }
  0x53   :  { %v247_v36 = vrot.slane %v246_v35, 4 }
  0x55   :  { %v248_v37 = vadd.f32 %v247_v36, %v246_v35 }
  0x57   :  { %v249_v38 = vrot.slane %v248_v37, 2 }
  0x59   :  { %v250_v39 = vadd.f32 %v249_v38, %v248_v37 }
  0x5b   :  { %v251_v40 = vrot.slane %v250_v39, 1 }
  0x5d   :  { %v252_v42 = vadd.f32 %v251_v40, %v250_v39 }
  0x5f   :  { %v253_v43 = vadd.f32 %v252_v42, %v132_v41 }
  0x61   :  { %255 = vst.msk [vmem:[#allocation2] sm:$0x1] %vm16_vm0, %v253_v43 }
  0x62   :  { %283 = shalt.err (!%p280_p4)
}
  0x63   :  { %s284_s25 = scalar_lea.hbm %s595_s2, 16 }
  0x64   :  { %p285_p5 = scmp.ne.s32.totalorder %s595_s2, %s284_s25  ;;  %p288_p6 = scmp.lt.u32.totalorder %s284_s25, %s595_s2 }
  0x66   :  { %p290_p7 = pnand %p288_p6, %p285_p5 }
  0x68   :  { %293 = shalt.err (!%p290_p7)
}
  0x69   :  { %265 = dma.vmem_to_hbm [thread:$0]  %s263_s1, 16, %s595_s2, [#allocation3]  }
  0x6a   :  { %294 = dma.done.wait [#allocation3], 16  }
  0x6b   :  { %295 = vsyncadd [#allocation3], 4294967280 }
  0x6c   :  { %269 = vsyncpa [#allocation3], 1 }

</bundles_post_ra>
